<compile_context>
chip_gen: v7x
topology: tpu7x:2x2x1
jax: 0.10.0
libtpu: 0.0.40
codegen_flags: <defaults>
</compile_context>

<pallas_src>
import jax
import jax.numpy as jnp
from jax.experimental import pallas as pl
from jax.experimental.pallas import tpu as pltpu

EPS = 1e-5


def temporal_kernel(x_ref, w1_ref, w2_ref, bn1_ref, bn2_ref, out_ref):
    B = x_ref.shape[0]
    H = w2_ref.shape[0]
    inv_n = 1.0 / (2.0 * B)              # BN stats over batch * spatial(=2*1) elements

    x = x_ref[...].astype(jnp.float32)                                    # (B, Z)

    # ---- ConvTranspose2d(Z, H, kernel=(2,1)) : one fused matmul ------------------
    # w1_ref is (Z, 2H): lanes [0:H] = time-step 0 weights, [H:2H] = time-step 1.
    h_cat = jnp.dot(x, w1_ref[...], preferred_element_type=jnp.float32)   # (B, 2H)

    # Fold time onto sublanes: rows [0:B] = t0, rows [B:2B] = t1.
    h = jnp.concatenate([h_cat[:, :H], h_cat[:, H:]], axis=0)             # (2B, H)

    # ---- BatchNorm2d(H) (training-mode batch stats, biased var) + ReLU -----------
    mu1 = jnp.sum(h, axis=0, keepdims=True) * inv_n                       # (1, H)
    d1 = h - mu1
    var1 = jnp.sum(d1 * d1, axis=0, keepdims=True) * inv_n                # (1, H)
    scale1 = jax.lax.rsqrt(var1 + EPS) * bn1_ref[0:1, :]                  # gamma1
    h = jnp.maximum(d1 * scale1 + bn1_ref[1:2, :], 0.0)                   # + beta1, ReLU

    # ---- ConvTranspose2d(H, Z, kernel=(1,1)) : one matmul on the fused tensor ----
    y = jnp.dot(h, w2_ref[...], preferred_element_type=jnp.float32)       # (2B, Z)

    # ---- BatchNorm2d(Z) + ReLU -----------------------------------------------------
    mu2 = jnp.sum(y, axis=0, keepdims=True) * inv_n                       # (1, Z)
    d2 = y - mu2
    var2 = jnp.sum(d2 * d2, axis=0, keepdims=True) * inv_n                # (1, Z)
    scale2 = jax.lax.rsqrt(var2 + EPS) * bn2_ref[0:1, :]                  # gamma2
    out_ref[...] = jnp.maximum(d2 * scale2 + bn2_ref[1:2, :], 0.0)        # (2B, Z)


def temporal_network(x, params):
    """x: (B, Z) float32 noise -> (B, Z, n_bars=2) float32 (matches PyTorch output)."""
    B, Z = x.shape
    H = params["w2"].shape[0]

    full = lambda shape: pl.BlockSpec(shape, lambda i: (0,) * len(shape))

    out = pl.pallas_call(
        temporal_kernel,
        out_shape=jax.ShapeDtypeStruct((2 * B, Z), jnp.float32),
        grid=(1,),
        in_specs=[
            full((B, Z)),         # x
            full((Z, 2 * H)),     # w1 packed (time-fused along lanes)
            full((H, Z)),         # w2
            full((2, H)),         # [gamma1; beta1]
            full((2, Z)),         # [gamma2; beta2]
        ],
        out_specs=full((2 * B, Z)),
        compiler_params=pltpu.CompilerParams(
            dimension_semantics=("arbitrary",)),
    )(x, params["w1cat"], params["w2"], params["bn1"], params["bn2"])

    # (2B, Z): rows [0:B]=bar0, [B:2B]=bar1  ->  (B, Z, n_bars)  (layout plumbing only)
    return jnp.transpose(out.reshape(2, B, Z), (1, 2, 0))


def init_params(key, z_dim, hid):
    """Deterministic synthetic parameters with the same shapes as the PyTorch module."""
    k1, k2, k3, k4 = jax.random.split(key, 4)
    # ConvTranspose2d weight layout is (in_ch, out_ch, kH, kW)
    w1_pt = jax.random.normal(k1, (z_dim, hid, 2, 1), jnp.float32) * 0.05   # conv1 weight
    b1 = jax.random.normal(k2, (hid,), jnp.float32) * 0.05                  # conv1 bias
    w2_pt = jax.random.normal(k3, (hid, z_dim, 1, 1), jnp.float32) * 0.05   # conv2 weight
    b2 = jax.random.normal(k4, (z_dim,), jnp.float32) * 0.05                # conv2 bias
    g1 = jnp.ones((hid,), jnp.float32)
    be1 = jnp.zeros((hid,), jnp.float32)
    g2 = jnp.ones((z_dim,), jnp.float32)
    be2 = jnp.zeros((z_dim,), jnp.float32)
    return {
        # --- packed, kernel-side parameters (host-side packing is free) ---
        "w1cat": jnp.concatenate([w1_pt[:, :, 0, 0], w1_pt[:, :, 1, 0]], axis=1),  # (Z, 2H)
        "w2": w2_pt[:, :, 0, 0],                                                    # (H, Z)
        "bn1": jnp.stack([g1, be1], axis=0),                                        # (2, H)
        "bn2": jnp.stack([g2, be2], axis=0),                                        # (2, Z)
        # --- full PyTorch-layout parameters for the reference (biases included) ---
        "w1_t": jnp.transpose(w1_pt[:, :, :, 0], (2, 0, 1)),                        # (2, Z, H)
        "b1": b1.reshape(1, hid), "g1": g1.reshape(1, hid), "be1": be1.reshape(1, hid),
        "b2": b2.reshape(1, z_dim), "g2": g2.reshape(1, z_dim), "be2": be2.reshape(1, z_dim),
    }


def temporal_network_ref(x, p):
    """Pure-JAX reference of the PyTorch forward (training-mode BN, conv biases kept)."""
    h0 = x @ p["w1_t"][0] + p["b1"]
    h1 = x @ p["w1_t"][1] + p["b1"]
    h = jnp.stack([h0, h1], 0)                                # (2, B, H)
    mu = h.mean(axis=(0, 1), keepdims=True)
    var = ((h - mu) ** 2).mean(axis=(0, 1), keepdims=True)
    h = jnp.maximum((h - mu) / jnp.sqrt(var + EPS) * p["g1"] + p["be1"], 0.0)
    y = h @ p["w2"] + p["b2"]                                  # (2, B, Z)
    mu2 = y.mean(axis=(0, 1), keepdims=True)
    var2 = ((y - mu2) ** 2).mean(axis=(0, 1), keepdims=True)
    y = jnp.maximum((y - mu2) / jnp.sqrt(var2 + EPS) * p["g2"] + p["be2"], 0.0)
    return jnp.transpose(y, (1, 2, 0))                         # (B, Z, 2)


if __name__ == "__main__":
    # Small shapes consistent with the module: z_dimension=32, hid_channels=64, n_bars=2.
    B, Z, H = 8, 32, 64
    key = jax.random.PRNGKey(0)
    kx, kp = jax.random.split(key)
    x = jax.random.normal(kx, (B, Z), jnp.float32)
    params = init_params(kp, Z, H)

    out = jax.block_until_ready(temporal_network(x, params))
    assert out.shape == (B, Z, 2), out.shape

    ref = jax.block_until_ready(temporal_network_ref(x, params))
    assert jnp.allclose(out, ref, atol=1e-4, rtol=1e-4)

    print("KERNEL_OK")
</pallas_src>

<mosaic_0001>
module attributes {stable_mosaic.version = 11 : i64} {
  func.func @temporal_kernel(%arg0: i32, %arg1: memref<8x32xf32, #tpu.memory_space<vmem>>, %arg2: memref<32x128xf32, #tpu.memory_space<vmem>>, %arg3: memref<64x32xf32, #tpu.memory_space<vmem>>, %arg4: memref<2x64xf32, #tpu.memory_space<vmem>>, %arg5: memref<2x32xf32, #tpu.memory_space<vmem>>, %arg6: memref<16x32xf32, #tpu.memory_space<vmem>>) attributes {dimension_semantics = [#tpu.dimension_semantics<arbitrary>], iteration_bounds = array<i64: 1>, scalar_prefetch = 0 : i64, scratch_operands = 0 : i64, tpu.core_type = #tpu.core_type<tc>, window_params = [{pipeline_mode = #tpu.pipeline_mode<synchronous>, transform_indices = @transform_0, window_bounds = array<i64: 8, 32>}, {pipeline_mode = #tpu.pipeline_mode<synchronous>, transform_indices = @transform_1, window_bounds = array<i64: 32, 128>}, {pipeline_mode = #tpu.pipeline_mode<synchronous>, transform_indices = @transform_2, window_bounds = array<i64: 64, 32>}, {pipeline_mode = #tpu.pipeline_mode<synchronous>, transform_indices = @transform_3, window_bounds = array<i64: 2, 64>}, {pipeline_mode = #tpu.pipeline_mode<synchronous>, transform_indices = @transform_4, window_bounds = array<i64: 2, 32>}, {pipeline_mode = #tpu.pipeline_mode<synchronous>, transform_indices = @transform_5, window_bounds = array<i64: 16, 32>}]} {
    %c0 = arith.constant 0 : index
    %c0_0 = arith.constant 0 : index
    %0 = vector.load %arg1[%c0, %c0_0] : memref<8x32xf32, #tpu.memory_space<vmem>>, vector<8x32xf32>
    %c0_1 = arith.constant 0 : index
    %c0_2 = arith.constant 0 : index
    %1 = vector.load %arg2[%c0_1, %c0_2] : memref<32x128xf32, #tpu.memory_space<vmem>>, vector<32x128xf32>
    %cst = arith.constant dense<0.000000e+00> : vector<8x128xf32>
    %2 = tpu.matmul %0, %1, %cst {dimension_numbers = #tpu.dot_dimension_numbers<[1], [0], [0], [1], [0, 0, 1, 1], [], []>} : vector<8x32xf32>, vector<32x128xf32>, vector<8x128xf32> -> vector<8x128xf32>
    %3 = vector.extract_strided_slice %2 {offsets = [0, 0], sizes = [8, 64], strides = [1, 1]} : vector<8x128xf32> to vector<8x64xf32>
    %4 = vector.extract_strided_slice %2 {offsets = [0, 64], sizes = [8, 64], strides = [1, 1]} : vector<8x128xf32> to vector<8x64xf32>
    %5 = tpu.concatenate %3, %4 in 0 : vector<8x64xf32>, vector<8x64xf32> -> vector<16x64xf32>
    %cst_3 = arith.constant dense<0.000000e+00> : vector<64xf32>
    %6 = vector.multi_reduction <add>, %5, %cst_3 [0] : vector<16x64xf32> to vector<64xf32>
    %7 = vector.shape_cast %6 : vector<64xf32> to vector<1x64xf32>
    %cst_4 = arith.constant 6.250000e-02 : f32
    %8 = vector.broadcast %cst_4 : f32 to vector<1x64xf32>
    %9 = arith.mulf %7, %8 : vector<1x64xf32>
    %10 = vector.broadcast %9 : vector<1x64xf32> to vector<16x64xf32>
    %11 = arith.subf %5, %10 : vector<16x64xf32>
    %12 = arith.mulf %11, %11 : vector<16x64xf32>
    %cst_5 = arith.constant dense<0.000000e+00> : vector<64xf32>
    %13 = vector.multi_reduction <add>, %12, %cst_5 [0] : vector<16x64xf32> to vector<64xf32>
    %14 = vector.shape_cast %13 : vector<64xf32> to vector<1x64xf32>
    %cst_6 = arith.constant 6.250000e-02 : f32
    %15 = vector.broadcast %cst_6 : f32 to vector<1x64xf32>
    %16 = arith.mulf %14, %15 : vector<1x64xf32>
    %cst_7 = arith.constant 9.99999974E-6 : f32
    %17 = vector.broadcast %cst_7 : f32 to vector<1x64xf32>
    %18 = arith.addf %16, %17 : vector<1x64xf32>
    %19 = math.rsqrt %18 : vector<1x64xf32>
    %c0_8 = arith.constant 0 : index
    %c0_9 = arith.constant 0 : index
    %20 = vector.load %arg4[%c0_8, %c0_9] : memref<2x64xf32, #tpu.memory_space<vmem>>, vector<1x64xf32>
    %21 = arith.mulf %19, %20 : vector<1x64xf32>
    %22 = vector.broadcast %21 : vector<1x64xf32> to vector<16x64xf32>
    %23 = arith.mulf %11, %22 : vector<16x64xf32>
    %c1 = arith.constant 1 : index
    %c0_10 = arith.constant 0 : index
    %24 = vector.load %arg4[%c1, %c0_10] : memref<2x64xf32, #tpu.memory_space<vmem>>, vector<1x64xf32>
    %25 = vector.broadcast %24 : vector<1x64xf32> to vector<16x64xf32>
    %26 = arith.addf %23, %25 : vector<16x64xf32>
    %cst_11 = arith.constant 0.000000e+00 : f32
    %27 = vector.broadcast %cst_11 : f32 to vector<16x64xf32>
    %28 = arith.maximumf %26, %27 : vector<16x64xf32>
    %c0_12 = arith.constant 0 : index
    %c0_13 = arith.constant 0 : index
    %29 = vector.load %arg3[%c0_12, %c0_13] : memref<64x32xf32, #tpu.memory_space<vmem>>, vector<64x32xf32>
    %cst_14 = arith.constant dense<0.000000e+00> : vector<16x32xf32>
    %30 = tpu.matmul %28, %29, %cst_14 {dimension_numbers = #tpu.dot_dimension_numbers<[1], [0], [0], [1], [0, 0, 1, 1], [], []>} : vector<16x64xf32>, vector<64x32xf32>, vector<16x32xf32> -> vector<16x32xf32>
    %cst_15 = arith.constant dense<0.000000e+00> : vector<32xf32>
    %31 = vector.multi_reduction <add>, %30, %cst_15 [0] : vector<16x32xf32> to vector<32xf32>
    %32 = vector.shape_cast %31 : vector<32xf32> to vector<1x32xf32>
    %cst_16 = arith.constant 6.250000e-02 : f32
    %33 = vector.broadcast %cst_16 : f32 to vector<1x32xf32>
    %34 = arith.mulf %32, %33 : vector<1x32xf32>
    %35 = vector.broadcast %34 : vector<1x32xf32> to vector<16x32xf32>
    %36 = arith.subf %30, %35 : vector<16x32xf32>
    %37 = arith.mulf %36, %36 : vector<16x32xf32>
    %cst_17 = arith.constant dense<0.000000e+00> : vector<32xf32>
    %38 = vector.multi_reduction <add>, %37, %cst_17 [0] : vector<16x32xf32> to vector<32xf32>
    %39 = vector.shape_cast %38 : vector<32xf32> to vector<1x32xf32>
    %cst_18 = arith.constant 6.250000e-02 : f32
    %40 = vector.broadcast %cst_18 : f32 to vector<1x32xf32>
    %41 = arith.mulf %39, %40 : vector<1x32xf32>
    %cst_19 = arith.constant 9.99999974E-6 : f32
    %42 = vector.broadcast %cst_19 : f32 to vector<1x32xf32>
    %43 = arith.addf %41, %42 : vector<1x32xf32>
    %44 = math.rsqrt %43 : vector<1x32xf32>
    %c0_20 = arith.constant 0 : index
    %c0_21 = arith.constant 0 : index
    %45 = vector.load %arg5[%c0_20, %c0_21] : memref<2x32xf32, #tpu.memory_space<vmem>>, vector<1x32xf32>
    %46 = arith.mulf %44, %45 : vector<1x32xf32>
    %47 = vector.broadcast %46 : vector<1x32xf32> to vector<16x32xf32>
    %48 = arith.mulf %36, %47 : vector<16x32xf32>
    %c1_22 = arith.constant 1 : index
    %c0_23 = arith.constant 0 : index
    %49 = vector.load %arg5[%c1_22, %c0_23] : memref<2x32xf32, #tpu.memory_space<vmem>>, vector<1x32xf32>
    %50 = vector.broadcast %49 : vector<1x32xf32> to vector<16x32xf32>
    %51 = arith.addf %48, %50 : vector<16x32xf32>
    %cst_24 = arith.constant 0.000000e+00 : f32
    %52 = vector.broadcast %cst_24 : f32 to vector<16x32xf32>
    %53 = arith.maximumf %51, %52 : vector<16x32xf32>
    %c0_25 = arith.constant 0 : index
    %c0_26 = arith.constant 0 : index
    %54 = vector.load %arg6[%c0_25, %c0_26] : memref<16x32xf32, #tpu.memory_space<vmem>>, vector<16x32xf32>
    tpu.vector_store %arg6[%c0_25, %c0_26], %53 {strides = array<i32>} : memref<16x32xf32, #tpu.memory_space<vmem>>, vector<16x32xf32>,
    return
  }
  func.func @transform_0(%arg0: i32) -> (i32, i32) {
    %c0_i32 = arith.constant 0 : i32
    %c0_i32_0 = arith.constant 0 : i32
    %c0_i32_1 = arith.constant 0 : i32
    return %c0_i32, %c0_i32_0 : i32, i32
  }
  func.func @transform_1(%arg0: i32) -> (i32, i32) {
    %c0_i32 = arith.constant 0 : i32
    %c0_i32_0 = arith.constant 0 : i32
    %c0_i32_1 = arith.constant 0 : i32
    return %c0_i32, %c0_i32_0 : i32, i32
  }
  func.func @transform_2(%arg0: i32) -> (i32, i32) {
    %c0_i32 = arith.constant 0 : i32
    %c0_i32_0 = arith.constant 0 : i32
    %c0_i32_1 = arith.constant 0 : i32
    return %c0_i32, %c0_i32_0 : i32, i32
  }
  func.func @transform_3(%arg0: i32) -> (i32, i32) {
    %c0_i32 = arith.constant 0 : i32
    %c0_i32_0 = arith.constant 0 : i32
    %c0_i32_1 = arith.constant 0 : i32
    return %c0_i32, %c0_i32_0 : i32, i32
  }
  func.func @transform_4(%arg0: i32) -> (i32, i32) {
    %c0_i32 = arith.constant 0 : i32
    %c0_i32_0 = arith.constant 0 : i32
    %c0_i32_1 = arith.constant 0 : i32
    return %c0_i32, %c0_i32_0 : i32, i32
  }
  func.func @transform_5(%arg0: i32) -> (i32, i32) {
    %c0_i32 = arith.constant 0 : i32
    %c0_i32_0 = arith.constant 0 : i32
    %c0_i32_1 = arith.constant 0 : i32
    return %c0_i32, %c0_i32_0 : i32, i32
  }
}

</mosaic_0001>

<bundles_post_ra>
// kernel: tpu_custom_call.1
= control target key start
LH: loop header
LB: loop body
LE: loop exit
PB: predicated region body
PF: predicated region fallthrough
CT: control target
= control target key end

     0   :  { %v405_v3 = vmov 0.0|0.0   ;;  %vm406_vm0 = vmmov 0   ;;  %v407_v6 = vmov 0.0   ;;  %s518_s0 = inlined_call_operand.vmem [shape: f32[8,32], index: 0, kind: input, shape index: {}]   ;;  %s519_s1 = inlined_call_operand.vmem [shape: f32[32,128], index: 1, kind: input, shape index: {}]   ;;  %s520_s2 = inlined_call_operand.vmem [shape: f32[64,32], index: 2, kind: input, shape index: {}]   ;;  %s521_s3 = inlined_call_operand.vmem [shape: f32[2,64], index: 3, kind: input, shape index: {}]   ;;  %s522_s4 = inlined_call_operand.vmem [shape: f32[2,32], index: 4, kind: input, shape index: {}]   ;;  %s523_s5 = inlined_call_operand.hbm [shape: f32[16,32], index: 5, kind: output, shape index: {}]  }
   0x1   :  { %v22_v0 = vld [vmem:[%s519_s1] sm:$0xff]  ;;  %v23_v1 = vld [vmem:[%s519_s1 + $0x8] sm:$0xff]  ;;  %v24_v2 = vld [vmem:[%s519_s1 + $0x10] sm:$0xff]  ;;  %348 = vmatprep.subr.bf16.mxu0 %v405_v3  ;;  %326 = vmatprep.mubr.msk.f32.mxu0 %vm406_vm0, %v407_v6 }
   0x2   :  { %v349_v4 = vpack.c.bf16 %v23_v1, %v22_v0  ;;  %v25_v5 = vld [vmem:[%s519_s1 + $0x18] sm:$0xff] }
   0x3   :  { %10 = vsyncpa [#allocation3], 0  ;;  %v352_v7 = vpack.c.bf16 %v25_v5, %v24_v2  ;;  %v21_v8 = vld [vmem:[%s518_s0] sm:$0xff]  ;;  %vm26_vm1 = vcmask 261120   ;;  %s408_s28 = smov 64   ;;  %v149_v12 = vld [vmem:[%s520_s2 + $0x8] sm:$0xff]  ;;  %v133_v49 = vlaneseq }
   0x4   :  { %350 = vmatpush3.bf16.msra.mxu0 %v349_v4  ;;  %v148_v11 = vld [vmem:[%s520_s2] sm:$0xff]  ;;  %v150_v14 = vld [vmem:[%s520_s2 + $0x10] sm:$0xff]  ;;  %v151_v15 = vld [vmem:[%s520_s2 + $0x18] sm:$0xff]  ;;  %vm104_vm2 = vcmask 523264   ;;  %s409_s24 = smov [#allocation2]  }
   0x5   :  { %351 = vmatprep.subr.bf16.mxu0 %v405_v3  ;;  %v354_v13 = vpack.c.bf16 %v149_v12, %v148_v11  ;;  %v358_v16 = vpack.c.bf16 %v151_v15, %v150_v14  ;;  %v152_v17 = vld [vmem:[%s520_s2 + $0x20] sm:$0xff]  ;;  %v153_v18 = vld [vmem:[%s520_s2 + $0x28] sm:$0xff]  ;;  %v154_v20 = vld [vmem:[%s520_s2 + $0x30] sm:$0xff]  ;;  %v134_v50 = vshrl.u32 %v133_v49, 7  ;;  %s287_s25 = sshll.u32 %s409_s24, 4  ;;  %s288_s25 = int_to_ptr.vmem [resolvable:$true] %s287_s25 }
   0x6   :  { %v362_v19 = vpack.c.bf16 %v153_v18, %v152_v17  ;;  %v155_v21 = vld [vmem:[%s520_s2 + $0x38] sm:$0xff]  ;;  %v131_v51 = vld [vmem:[%s521_s3] sm:$0x1]  ;;  %v299_v56 = vld [vmem:[%s521_s3 + $0x1] ss:$0 sm:$0xff]  ;;  %s381_s26 = scalar_lea.vmem %s288_s25, 256  ;;  %p386_p1 = scmp.lt.s32.totalorder %s288_s25, %s288_s25 }
   0x7   :  { %355 = vmatprep.subr.bf16.mxu1 %v354_v13  ;;  %v366_v22 = vpack.c.bf16 %v155_v21, %v154_v20  ;;  %v135_v52 = vsub.s32 0, %v134_v50  ;;  %p382_p0 = scmp.ne.s32.totalorder %s288_s25, %s381_s26  ;;  %p387_p2 = scmp.lt.s32.totalorder %s381_s26, %s381_s26 }
   0x8   :  { %353 = vmatpush3.bf16.msra.mxu0 %v352_v7  ;;  %357 = vmatpush3.bf16.msra.mxu1 %v354_v13 }
   0x9   :  { %359 = vmatprep.subr.bf16.mxu1 %v358_v16  ;;  %p388_p3 = por %p387_p2, %p386_p1 }
   0xb   :  { %327 = vmatmul.mubr.msk.f32.vlgmr.msra.gmra.mrb[0].mxu0 %vm26_vm1, %v21_v8  ;;  %p389_p4 = pnand %p388_p3, %p382_p0 }
   0xc   :  { %361 = vmatpush3.bf16.msra.mxu1 %v358_v16 }
   0xd   :  { %363 = vmatprep.subr.bf16.mxu1 %v362_v19 }
  0x10   :  { %365 = vmatpush3.bf16.msra.mxu1 %v362_v19 }
  0x11   :  { %367 = vmatprep.subr.bf16.mxu1 %v366_v22 }
  0x14   :  { %369 = vmatpush3.bf16.msra.mxu1 %v366_v22 }
  0xde   :  { %v96_v9 = vpop.f32.mrb[0].mxu0 }
  0xdf   :  { %v328_v10 = vpop.f32.mrb[1].mxu0  ;;  %101 = vrot.lane.b32.xlu0 %v96_v9, %s408_s28  ;;  %v105_v24 = vsel %vm104_vm2, %v96_v9, 0.0 }
 0x151   :  { %v102_v23 = vpop.permute.xlu0 %101 }
 0x152   :  { %v106_v25 = vsel %vm104_vm2, %v102_v23, 0.0 }
 0x153   :  { %v107_v26 = vadd.f32 %v106_v25, %v105_v24 }
 0x155   :  { %v108_v27 = vrot.slane %v107_v26, 4 }
 0x157   :  { %v109_v28 = vadd.f32 %v108_v27, %v107_v26  ;;  %v263_v26 = vld [vmem:[%s522_s4] sm:$0x1] }
 0x159   :  { %v110_v29 = vrot.slane %v109_v28, 2 }
 0x15b   :  { %v111_v30 = vadd.f32 %v110_v29, %v109_v28 }
 0x15d   :  { %v112_v31 = vrot.slane %v111_v30, 1 }
 0x15f   :  { %v113_v32 = vadd.f32 %v112_v31, %v111_v30  ;;  %v302_v30 = vld [vmem:[%s522_s4 + $0x1] ss:$0 sm:$0xff] }
 0x161   :  { %v114_v33 = vmul.f32 0.0625, %v113_v32 }
 0x163   :  { %v115_v34 = vsub.f32 %v96_v9, %v114_v33  ;;  %v116_v35 = vsub.f32 %v102_v23, %v114_v33 }
 0x165   :  { %v117_v36 = vmul.f32 %v115_v34, %v115_v34  ;;  %v118_v37 = vmul.f32 %v116_v35, %v116_v35 }
 0x167   :  { %v119_v38 = vsel %vm104_vm2, %v117_v36, 0.0  ;;  %v120_v39 = vsel %vm104_vm2, %v118_v37, 0.0 }
 0x168   :  { %v121_v40 = vadd.f32 %v120_v39, %v119_v38 }
 0x16a   :  { %v122_v41 = vrot.slane %v121_v40, 4 }
 0x16c   :  { %v123_v42 = vadd.f32 %v122_v41, %v121_v40 }
 0x16e   :  { %v124_v43 = vrot.slane %v123_v42, 2 }
 0x170   :  { %v125_v44 = vadd.f32 %v124_v43, %v123_v42 }
 0x172   :  { %v126_v45 = vrot.slane %v125_v44, 1 }
 0x174   :  { %v127_v46 = vadd.f32 %v126_v45, %v125_v44 }
 0x176   :  { %v128_v47 = vmul.f32 0.0625, %v127_v46 }
 0x178   :  { %v129_v48 = vadd.f32 1e-05, %v128_v47 }
 0x17a   :  { %377 = vrsqrt.f32 %v129_v48 }
 0x184   :  { %v378_v53 = vpop.eup %377 }
 0x185   :  { %v132_v54 = vmul.f32 %v378_v53, %v131_v51 }
 0x187   :  { %v136_v55 = vrot.slane %v132_v54, %v135_v52 }
 0x189   :  { %v138_v57 = vmul.f32 %v136_v55, %v116_v35  ;;  %v137_v58 = vmul.f32 %v136_v55, %v115_v34 }
 0x18b   :  { %v144_v59 = vadd.f32 %v299_v56, %v137_v58  ;;  %v145_v60 = vadd.f32 %v299_v56, %v138_v57 }
 0x18d   :  { %v146_v61 = vmax.f32 %v144_v59, 0.0  ;;  %v147_v62 = vmax.f32 %v145_v60, 0.0 }
 0x18f   :  { %345 = vmatprep.mubr.msk.f32.mxu1 %vm104_vm2, %v146_v61 }
 0x190   :  { %346 = vmatmul.mubr.msk.f32.vlgmr.msra.gmra.mrb[0].mxu1 %vm104_vm2, %v147_v62 }
 0x263   :  { %v347_v63 = vpop.f32.mrb[0].mxu1 }
 0x264   :  { %v238_v0 = vsel %vm26_vm1, %v347_v63, 0.0  ;;  %v228_v1 = vpop.f32.mrb[1].mxu1 }
 0x265   :  { %v237_v2 = vsel %vm26_vm1, %v228_v1, 0.0 }
 0x266   :  { %v239_v3 = vadd.f32 %v238_v0, %v237_v2 }
 0x268   :  { %v240_v4 = vrot.slane %v239_v3, 4 }
 0x26a   :  { %v241_v5 = vadd.f32 %v240_v4, %v239_v3 }
 0x26c   :  { %v242_v6 = vrot.slane %v241_v5, 2 }
 0x26e   :  { %v243_v7 = vadd.f32 %v242_v6, %v241_v5 }
 0x270   :  { %v244_v8 = vrot.slane %v243_v7, 1 }
 0x272   :  { %v245_v9 = vadd.f32 %v244_v8, %v243_v7 }
 0x274   :  { %v246_v10 = vmul.f32 0.0625, %v245_v9 }
 0x276   :  { %v247_v11 = vsub.f32 %v228_v1, %v246_v10  ;;  %v248_v12 = vsub.f32 %v347_v63, %v246_v10 }
 0x278   :  { %v249_v13 = vmul.f32 %v247_v11, %v247_v11  ;;  %v250_v14 = vmul.f32 %v248_v12, %v248_v12 }
 0x27a   :  { %v251_v15 = vsel %vm26_vm1, %v249_v13, 0.0  ;;  %v252_v16 = vsel %vm26_vm1, %v250_v14, 0.0 }
 0x27b   :  { %v253_v17 = vadd.f32 %v252_v16, %v251_v15 }
 0x27d   :  { %v254_v18 = vrot.slane %v253_v17, 4 }
 0x27f   :  { %v255_v19 = vadd.f32 %v254_v18, %v253_v17 }
 0x281   :  { %v256_v20 = vrot.slane %v255_v19, 2 }
 0x283   :  { %v257_v21 = vadd.f32 %v256_v20, %v255_v19 }
 0x285   :  { %v258_v22 = vrot.slane %v257_v21, 1 }
 0x287   :  { %v259_v23 = vadd.f32 %v258_v22, %v257_v21 }
 0x289   :  { %v260_v24 = vmul.f32 0.0625, %v259_v23 }
 0x28b   :  { %v261_v25 = vadd.f32 1e-05, %v260_v24 }
 0x28d   :  { %379 = vrsqrt.f32 %v261_v25 }
 0x297   :  { %v380_v27 = vpop.eup %379 }
 0x298   :  { %v264_v28 = vmul.f32 %v380_v27, %v263_v26 }
 0x29a   :  { %v268_v29 = vrot.slane %v264_v28, %v135_v52 }
 0x29c   :  { %v269_v31 = vmul.f32 %v268_v29, %v247_v11  ;;  %v270_v32 = vmul.f32 %v268_v29, %v248_v12 }
 0x29e   :  { %v276_v33 = vadd.f32 %v302_v30, %v269_v31  ;;  %v277_v34 = vadd.f32 %v302_v30, %v270_v32 }
 0x2a0   :  { %v278_v35 = vmax.f32 %v276_v33, 0.0  ;;  %v279_v36 = vmax.f32 %v277_v34, 0.0 }
 0x2a2   :  { %280 = vst.msk [vmem:[#allocation2] sm:$0xff] %vm26_vm1, %v278_v35  ;;  %281 = vst.msk [vmem:[#allocation2 + $0x8] sm:$0xff] %vm26_vm1, %v279_v36 }
 0x2a3   :  { %392 = shalt.err (!%p389_p4)
}
 0x2a4   :  { %s393_s28 = scalar_lea.hbm %s523_s5, 256 }
 0x2a5   :  { %p394_p5 = scmp.ne.s32.totalorder %s523_s5, %s393_s28  ;;  %p397_p6 = scmp.lt.u32.totalorder %s393_s28, %s523_s5 }
 0x2a7   :  { %p399_p7 = pnand %p397_p6, %p394_p5 }
 0x2a9   :  { %402 = shalt.err (!%p399_p7)
}
 0x2aa   :  { %s410_s7 = smov 128   ;;  %s411_s0 = smov 8  }
 0x2ab   :  { %293 = dma.vmem_to_hbm [thread:$0]  %s288_s25, 256, %s523_s5, [#allocation3], %s410_s7, %s410_s7, %s411_s0  }
 0x2ac   :  { %403 = dma.done.wait [#allocation3], 256  }
 0x2ad   :  { %404 = vsyncadd [#allocation3], 4294967040 }
 0x2ae   :  { %297 = vsyncpa [#allocation3], 1 }

</bundles_post_ra>
